<compile_context>
chip_gen: v6e
topology: v6e:2x2x1
jax: 0.10.0
libtpu: 0.0.40
codegen_flags: <defaults>
</compile_context>

<pallas_src>
import jax
import jax.numpy as jnp
from jax.experimental import pallas as pl
from jax.experimental.pallas import tpu as pltpu

LN_EPS = 1e-5


def _round_up(x, m):
    return ((x + m - 1) // m) * m


def residual_head_kernel(x_ref, gamma_ref, beta_ref, o_ref):
    # x_ref:     (n_inputs, tb, emb)
    # gamma_ref: (n_inputs, emb)
    # beta_ref:  (n_inputs, emb)
    # o_ref:     (tb, emb)
    n_inputs, _, emb = x_ref.shape
    inv_emb = jnp.float32(1.0 / emb)

    acc = None
    # Static unroll over the (small, fixed) number of inputs. Processing one
    # input at a time keeps the live working set at ~(tb, emb) f32 instead of
    # (n_inputs, tb, emb), which avoids spills once tb is large.
    for i in range(n_inputs):
        xi = x_ref[i].astype(jnp.float32)  # (tb, emb)

        # One-pass LayerNorm statistics: var = E[x^2] - mean^2.
        # The two lane reductions are independent (no serial XLU dependency).
        sum_x = jnp.sum(xi, axis=-1, keepdims=True)
        sum_x2 = jnp.sum(xi * xi, axis=-1, keepdims=True)
        mean = sum_x * inv_emb
        var = sum_x2 * inv_emb - mean * mean
        inv_std = jax.lax.rsqrt(var + LN_EPS)

        gamma_i = gamma_ref[pl.ds(i, 1), :].astype(jnp.float32)  # (1, emb)
        beta_i = beta_ref[pl.ds(i, 1), :].astype(jnp.float32)    # (1, emb)

        y = (xi - mean) * inv_std * gamma_i + beta_i
        y = jnp.maximum(y, 0.0)  # ReLU always applied (module overrides flag)
        acc = y if acc is None else acc + y

    o_ref[...] = acc.astype(o_ref.dtype)


def residual_head(x, gamma, beta, *, tb=None, vmem_budget_bytes=24 * 1024 * 1024):
    """out = sum_i relu(LayerNorm_i(x[i])).

    x: (n_inputs, batch, emb); gamma/beta: (n_inputs, emb).
    I/O stays in x.dtype (pass bf16 to halve HBM traffic for this mem-bound
    kernel); LayerNorm math is done in f32 inside the kernel.
    """
    n_inputs, batch, emb = x.shape
    assert gamma.shape == (n_inputs, emb) and beta.shape == (n_inputs, emb)

    itemsize = jnp.dtype(x.dtype).itemsize

    if tb is None:
        # Double-buffered per-step footprint: x block (n_inputs*tb*emb) and
        # out block (tb*emb), each x2 buffers. Size tb against a conservative
        # budget that fits every generation (v7x: 64 MiB physical VMEM).
        per_row = 2 * (n_inputs + 1) * emb * itemsize
        tb = max(8, min(1024, (vmem_budget_bytes // per_row) // 8 * 8))

    # Never tile wider than the (8-rounded) batch.
    tb = min(tb, _round_up(batch, 8))
    # Keep >=2 grid steps when there is enough work so the "parallel" axis can
    # shard across v7x's two TensorCores (no effect on v5e/v6e).
    if batch >= 16 and _round_up(batch, 8) // tb < 2:
        tb = max(8, _round_up(pl.cdiv(_round_up(batch, 8), 2), 8))

    padded_batch = _round_up(batch, tb)
    if padded_batch != batch:
        x = jnp.pad(x, ((0, 0), (0, padded_batch - batch), (0, 0)))

    # Raise the scoped-VMEM limit enough for the chosen tile (v5e defaults to
    # only 16 MiB) while leaving headroom under v7x's 64 MiB physical VMEM.
    step_bytes = (2 * (n_inputs + 1) * tb * emb * itemsize
                  + 4 * n_inputs * emb * itemsize)
    vmem_limit = max(16 * 1024 * 1024,
                     min(step_bytes + 8 * 1024 * 1024, 48 * 1024 * 1024))

    grid = (padded_batch // tb,)
    out = pl.pallas_call(
        residual_head_kernel,
        out_shape=jax.ShapeDtypeStruct((padded_batch, emb), x.dtype),
        grid_spec=pltpu.PrefetchScalarGridSpec(
            num_scalar_prefetch=0,
            grid=grid,
            in_specs=[
                pl.BlockSpec((n_inputs, tb, emb), lambda i: (0, i, 0)),
                pl.BlockSpec((n_inputs, emb), lambda i: (0, 0)),
                pl.BlockSpec((n_inputs, emb), lambda i: (0, 0)),
            ],
            out_specs=pl.BlockSpec((tb, emb), lambda i: (i, 0)),
        ),
        compiler_params=pltpu.CompilerParams(
            dimension_semantics=("parallel",),
            vmem_limit_bytes=vmem_limit,
        ),
    )(x, gamma, beta)

    if padded_batch != batch:
        out = out[:batch]
    return out


def residual_head_reference(x, gamma, beta):
    x = x.astype(jnp.float32)
    mean = jnp.mean(x, axis=-1, keepdims=True)
    var = jnp.mean((x - mean) ** 2, axis=-1, keepdims=True)
    normed = (x - mean) * jax.lax.rsqrt(var + LN_EPS)
    y = normed * gamma[:, None, :].astype(jnp.float32) + beta[:, None, :].astype(jnp.float32)
    y = jnp.maximum(y, 0.0)
    return jnp.sum(y, axis=0)


if __name__ == "__main__":
    n_inputs, batch, emb = 3, 8, 128

    key = jax.random.PRNGKey(0)
    kx, kg, kb = jax.random.split(key, 3)

    # Stacked pooler_outputs from the n_inputs encoders.
    x = jax.random.normal(kx, (n_inputs, batch, emb), dtype=jnp.float32)
    # Perturbed LayerNorm affine params so the transform is actually exercised.
    gamma = 1.0 + 0.1 * jax.random.normal(kg, (n_inputs, emb), dtype=jnp.float32)
    beta = 0.1 * jax.random.normal(kb, (n_inputs, emb), dtype=jnp.float32)

    out = jax.block_until_ready(residual_head(x, gamma, beta))
    ref = residual_head_reference(x, gamma, beta)
    assert out.shape == (batch, emb)
    assert jnp.allclose(out, ref, atol=1e-4, rtol=1e-4)

    # Ragged batch (not a multiple of the tile): exercises the padding path.
    batch2 = 12
    x2 = jax.random.normal(kb, (n_inputs, batch2, emb), dtype=jnp.float32)
    out2 = jax.block_until_ready(residual_head(x2, gamma, beta))
    ref2 = residual_head_reference(x2, gamma, beta)
    assert out2.shape == (batch2, emb)
    assert jnp.allclose(out2, ref2, atol=1e-4, rtol=1e-4)

    print("KERNEL_OK")
</pallas_src>

<mosaic_0001>
module attributes {stable_mosaic.version = 11 : i64} {
  func.func @residual_head_kernel(%arg0: i32, %arg1: memref<3x8x128xf32, #tpu.memory_space<vmem>>, %arg2: memref<3x128xf32, #tpu.memory_space<vmem>>, %arg3: memref<3x128xf32, #tpu.memory_space<vmem>>, %arg4: memref<8x128xf32, #tpu.memory_space<vmem>>) attributes {dimension_semantics = [#tpu.dimension_semantics<parallel>], iteration_bounds = array<i64: 1>, scalar_prefetch = 0 : i64, scratch_operands = 0 : i64, tpu.core_type = #tpu.core_type<tc>, window_params = [{transform_indices = @transform_0, window_bounds = array<i64: 3, 8, 128>}, {pipeline_mode = #tpu.pipeline_mode<synchronous>, transform_indices = @transform_1, window_bounds = array<i64: 3, 128>}, {pipeline_mode = #tpu.pipeline_mode<synchronous>, transform_indices = @transform_2, window_bounds = array<i64: 3, 128>}, {transform_indices = @transform_3, window_bounds = array<i64: 8, 128>}]} {
    %c0 = arith.constant 0 : index
    %c0_0 = arith.constant 0 : index
    %c0_1 = arith.constant 0 : index
    %0 = vector.load %arg1[%c0, %c0_0, %c0_1] : memref<3x8x128xf32, #tpu.memory_space<vmem>>, vector<1x8x128xf32>
    %1 = vector.shape_cast %0 : vector<1x8x128xf32> to vector<8x128xf32>
    %cst = arith.constant dense<0.000000e+00> : vector<8xf32>
    %2 = vector.multi_reduction <add>, %1, %cst [1] : vector<8x128xf32> to vector<8xf32>
    %3 = vector.shape_cast %2 : vector<8xf32> to vector<8x1xf32>
    %4 = arith.mulf %1, %1 : vector<8x128xf32>
    %cst_2 = arith.constant dense<0.000000e+00> : vector<8xf32>
    %5 = vector.multi_reduction <add>, %4, %cst_2 [1] : vector<8x128xf32> to vector<8xf32>
    %6 = vector.shape_cast %5 : vector<8xf32> to vector<8x1xf32>
    %cst_3 = arith.constant 7.812500e-03 : f32
    %7 = vector.broadcast %cst_3 : f32 to vector<8x1xf32>
    %8 = arith.mulf %3, %7 : vector<8x1xf32>
    %cst_4 = arith.constant 7.812500e-03 : f32
    %9 = vector.broadcast %cst_4 : f32 to vector<8x1xf32>
    %10 = arith.mulf %6, %9 : vector<8x1xf32>
    %11 = arith.mulf %8, %8 : vector<8x1xf32>
    %12 = arith.subf %10, %11 : vector<8x1xf32>
    %cst_5 = arith.constant 9.99999974E-6 : f32
    %13 = vector.broadcast %cst_5 : f32 to vector<8x1xf32>
    %14 = arith.addf %12, %13 : vector<8x1xf32>
    %15 = math.rsqrt %14 : vector<8x1xf32>
    %c0_6 = arith.constant 0 : index
    %c0_7 = arith.constant 0 : index
    %16 = vector.load %arg2[%c0_6, %c0_7] : memref<3x128xf32, #tpu.memory_space<vmem>>, vector<1x128xf32>
    %c0_8 = arith.constant 0 : index
    %c0_9 = arith.constant 0 : index
    %17 = vector.load %arg3[%c0_8, %c0_9] : memref<3x128xf32, #tpu.memory_space<vmem>>, vector<1x128xf32>
    %18 = vector.broadcast %8 : vector<8x1xf32> to vector<8x128xf32>
    %19 = arith.subf %1, %18 : vector<8x128xf32>
    %20 = vector.broadcast %15 : vector<8x1xf32> to vector<8x128xf32>
    %21 = arith.mulf %19, %20 : vector<8x128xf32>
    %22 = vector.broadcast %16 : vector<1x128xf32> to vector<8x128xf32>
    %23 = arith.mulf %21, %22 : vector<8x128xf32>
    %24 = vector.broadcast %17 : vector<1x128xf32> to vector<8x128xf32>
    %25 = arith.addf %23, %24 : vector<8x128xf32>
    %cst_10 = arith.constant 0.000000e+00 : f32
    %26 = vector.broadcast %cst_10 : f32 to vector<8x128xf32>
    %27 = arith.maximumf %25, %26 : vector<8x128xf32>
    %c1 = arith.constant 1 : index
    %c0_11 = arith.constant 0 : index
    %c0_12 = arith.constant 0 : index
    %28 = vector.load %arg1[%c1, %c0_11, %c0_12] : memref<3x8x128xf32, #tpu.memory_space<vmem>>, vector<1x8x128xf32>
    %29 = vector.shape_cast %28 : vector<1x8x128xf32> to vector<8x128xf32>
    %cst_13 = arith.constant dense<0.000000e+00> : vector<8xf32>
    %30 = vector.multi_reduction <add>, %29, %cst_13 [1] : vector<8x128xf32> to vector<8xf32>
    %31 = vector.shape_cast %30 : vector<8xf32> to vector<8x1xf32>
    %32 = arith.mulf %29, %29 : vector<8x128xf32>
    %cst_14 = arith.constant dense<0.000000e+00> : vector<8xf32>
    %33 = vector.multi_reduction <add>, %32, %cst_14 [1] : vector<8x128xf32> to vector<8xf32>
    %34 = vector.shape_cast %33 : vector<8xf32> to vector<8x1xf32>
    %cst_15 = arith.constant 7.812500e-03 : f32
    %35 = vector.broadcast %cst_15 : f32 to vector<8x1xf32>
    %36 = arith.mulf %31, %35 : vector<8x1xf32>
    %cst_16 = arith.constant 7.812500e-03 : f32
    %37 = vector.broadcast %cst_16 : f32 to vector<8x1xf32>
    %38 = arith.mulf %34, %37 : vector<8x1xf32>
    %39 = arith.mulf %36, %36 : vector<8x1xf32>
    %40 = arith.subf %38, %39 : vector<8x1xf32>
    %cst_17 = arith.constant 9.99999974E-6 : f32
    %41 = vector.broadcast %cst_17 : f32 to vector<8x1xf32>
    %42 = arith.addf %40, %41 : vector<8x1xf32>
    %43 = math.rsqrt %42 : vector<8x1xf32>
    %c1_18 = arith.constant 1 : index
    %c0_19 = arith.constant 0 : index
    %44 = vector.load %arg2[%c1_18, %c0_19] : memref<3x128xf32, #tpu.memory_space<vmem>>, vector<1x128xf32>
    %c1_20 = arith.constant 1 : index
    %c0_21 = arith.constant 0 : index
    %45 = vector.load %arg3[%c1_20, %c0_21] : memref<3x128xf32, #tpu.memory_space<vmem>>, vector<1x128xf32>
    %46 = vector.broadcast %36 : vector<8x1xf32> to vector<8x128xf32>
    %47 = arith.subf %29, %46 : vector<8x128xf32>
    %48 = vector.broadcast %43 : vector<8x1xf32> to vector<8x128xf32>
    %49 = arith.mulf %47, %48 : vector<8x128xf32>
    %50 = vector.broadcast %44 : vector<1x128xf32> to vector<8x128xf32>
    %51 = arith.mulf %49, %50 : vector<8x128xf32>
    %52 = vector.broadcast %45 : vector<1x128xf32> to vector<8x128xf32>
    %53 = arith.addf %51, %52 : vector<8x128xf32>
    %cst_22 = arith.constant 0.000000e+00 : f32
    %54 = vector.broadcast %cst_22 : f32 to vector<8x128xf32>
    %55 = arith.maximumf %53, %54 : vector<8x128xf32>
    %56 = arith.addf %27, %55 : vector<8x128xf32>
    %c2 = arith.constant 2 : index
    %c0_23 = arith.constant 0 : index
    %c0_24 = arith.constant 0 : index
    %57 = vector.load %arg1[%c2, %c0_23, %c0_24] : memref<3x8x128xf32, #tpu.memory_space<vmem>>, vector<1x8x128xf32>
    %58 = vector.shape_cast %57 : vector<1x8x128xf32> to vector<8x128xf32>
    %cst_25 = arith.constant dense<0.000000e+00> : vector<8xf32>
    %59 = vector.multi_reduction <add>, %58, %cst_25 [1] : vector<8x128xf32> to vector<8xf32>
    %60 = vector.shape_cast %59 : vector<8xf32> to vector<8x1xf32>
    %61 = arith.mulf %58, %58 : vector<8x128xf32>
    %cst_26 = arith.constant dense<0.000000e+00> : vector<8xf32>
    %62 = vector.multi_reduction <add>, %61, %cst_26 [1] : vector<8x128xf32> to vector<8xf32>
    %63 = vector.shape_cast %62 : vector<8xf32> to vector<8x1xf32>
    %cst_27 = arith.constant 7.812500e-03 : f32
    %64 = vector.broadcast %cst_27 : f32 to vector<8x1xf32>
    %65 = arith.mulf %60, %64 : vector<8x1xf32>
    %cst_28 = arith.constant 7.812500e-03 : f32
    %66 = vector.broadcast %cst_28 : f32 to vector<8x1xf32>
    %67 = arith.mulf %63, %66 : vector<8x1xf32>
    %68 = arith.mulf %65, %65 : vector<8x1xf32>
    %69 = arith.subf %67, %68 : vector<8x1xf32>
    %cst_29 = arith.constant 9.99999974E-6 : f32
    %70 = vector.broadcast %cst_29 : f32 to vector<8x1xf32>
    %71 = arith.addf %69, %70 : vector<8x1xf32>
    %72 = math.rsqrt %71 : vector<8x1xf32>
    %c2_30 = arith.constant 2 : index
    %c0_31 = arith.constant 0 : index
    %73 = vector.load %arg2[%c2_30, %c0_31] : memref<3x128xf32, #tpu.memory_space<vmem>>, vector<1x128xf32>
    %c2_32 = arith.constant 2 : index
    %c0_33 = arith.constant 0 : index
    %74 = vector.load %arg3[%c2_32, %c0_33] : memref<3x128xf32, #tpu.memory_space<vmem>>, vector<1x128xf32>
    %75 = vector.broadcast %65 : vector<8x1xf32> to vector<8x128xf32>
    %76 = arith.subf %58, %75 : vector<8x128xf32>
    %77 = vector.broadcast %72 : vector<8x1xf32> to vector<8x128xf32>
    %78 = arith.mulf %76, %77 : vector<8x128xf32>
    %79 = vector.broadcast %73 : vector<1x128xf32> to vector<8x128xf32>
    %80 = arith.mulf %78, %79 : vector<8x128xf32>
    %81 = vector.broadcast %74 : vector<1x128xf32> to vector<8x128xf32>
    %82 = arith.addf %80, %81 : vector<8x128xf32>
    %cst_34 = arith.constant 0.000000e+00 : f32
    %83 = vector.broadcast %cst_34 : f32 to vector<8x128xf32>
    %84 = arith.maximumf %82, %83 : vector<8x128xf32>
    %85 = arith.addf %56, %84 : vector<8x128xf32>
    %c0_35 = arith.constant 0 : index
    %c0_36 = arith.constant 0 : index
    %86 = vector.load %arg4[%c0_35, %c0_36] : memref<8x128xf32, #tpu.memory_space<vmem>>, vector<8x128xf32>
    tpu.vector_store %arg4[%c0_35, %c0_36], %85 {strides = array<i32>} : memref<8x128xf32, #tpu.memory_space<vmem>>, vector<8x128xf32>,
    return
  }
  func.func @transform_0(%arg0: i32) -> (i32, i32, i32) {
    %c0_i32 = arith.constant 0 : i32
    %c0_i32_0 = arith.constant 0 : i32
    %c0_i32_1 = arith.constant 0 : i32
    return %c0_i32, %arg0, %c0_i32_0 : i32, i32, i32
  }
  func.func @transform_1(%arg0: i32) -> (i32, i32) {
    %c0_i32 = arith.constant 0 : i32
    %c0_i32_0 = arith.constant 0 : i32
    %c0_i32_1 = arith.constant 0 : i32
    return %c0_i32, %c0_i32_0 : i32, i32
  }
  func.func @transform_2(%arg0: i32) -> (i32, i32) {
    %c0_i32 = arith.constant 0 : i32
    %c0_i32_0 = arith.constant 0 : i32
    %c0_i32_1 = arith.constant 0 : i32
    return %c0_i32, %c0_i32_0 : i32, i32
  }
  func.func @transform_3(%arg0: i32) -> (i32, i32) {
    %c0_i32 = arith.constant 0 : i32
    %c0_i32_0 = arith.constant 0 : i32
    return %arg0, %c0_i32 : i32, i32
  }
}

</mosaic_0001>

<bundles_post_ra>
// kernel: tpu_custom_call.1
= control target key start
LH: loop header
LB: loop body
LE: loop exit
PB: predicated region body
PF: predicated region fallthrough
CT: control target
= control target key end

     0   :  { %8 = vsyncpa [#allocation3], 0  ;;  %s296_s0 = inlined_call_operand.hbm [shape: f32[3,8,128], index: 0, kind: input, shape index: {}]   ;;  %s297_s1 = inlined_call_operand.hbm [shape: f32[3,128], index: 1, kind: input, shape index: {}]   ;;  %s298_s2 = inlined_call_operand.hbm [shape: f32[3,128], index: 2, kind: input, shape index: {}]   ;;  %s299_s3 = inlined_call_operand.hbm [shape: f32[8,128], index: 3, kind: output, shape index: {}]  }
   0x1   :  { %9 = vsyncpa [#allocation6], 0 }
   0x2   :  { %10 = vsyncpa [#allocation4], 0  ;;  %s258_s12 = smov [#allocation5]   ;;  %s259_s14 = smov [#allocation2]  }
   0x3   :  { %s29_s13 = sshll.u32 %s258_s12, 4  ;;  %s16_s15 = sshll.u32 %s259_s14, 4  ;;  %s30_s13 = int_to_ptr.vmem [resolvable:$true] %s29_s13  ;;  %s17_s15 = int_to_ptr.vmem [resolvable:$true] %s16_s15 }
   0x4   :  { %s180_s16 = scalar_lea.vmem %s30_s13, 64  ;;  %p185_p1 = scmp.lt.s32.totalorder %s30_s13, %s30_s13 }
   0x5   :  { %p181_p0 = scmp.ne.s32.totalorder %s30_s13, %s180_s16  ;;  %p186_p2 = scmp.lt.s32.totalorder %s180_s16, %s180_s16 }
   0x7   :  { %p187_p3 = por %p186_p2, %p185_p1 }
   0x9   :  { %p188_p4 = pnand %p187_p3, %p181_p0 }
   0xb   :  { %191 = shalt.err (!%p188_p4)
}
   0xc   :  { %32 = dma.hbm_to_vmem [thread:$0]  %s297_s1, 64, %s30_s13, [#allocation6]  }
   0xd   :  { %s200_s19 = scalar_lea.vmem %s17_s15, 384  ;;  %p205_p6 = scmp.lt.s32.totalorder %s17_s15, %s17_s15 }
   0xe   :  { %p201_p5 = scmp.ne.s32.totalorder %s17_s15, %s200_s19  ;;  %p206_p7 = scmp.lt.s32.totalorder %s200_s19, %s200_s19 }
  0x10   :  { %p207_p8 = por %p206_p7, %p205_p6 }
  0x12   :  { %p208_p9 = pnand %p207_p8, %p201_p5 }
  0x14   :  { %211 = shalt.err (!%p208_p9)
}
  0x15   :  { %s260_s20 = smov 128   ;;  %s261_s21 = smov 8  }
  0x16   :  { %22 = dma.hbm_to_vmem [thread:$0]  %s296_s0, 384, %s17_s15, [#allocation3], %s260_s20, %s260_s20, %s261_s21  }
  0x17   :  { %s262_s24 = smov [#allocation7]  }
  0x18   :  { %s39_s25 = sshll.u32 %s262_s24, 4  ;;  %s40_s25 = int_to_ptr.vmem [resolvable:$true] %s39_s25 }
  0x19   :  { %s220_s26 = scalar_lea.vmem %s40_s25, 64  ;;  %p225_p11 = scmp.lt.s32.totalorder %s40_s25, %s40_s25 }
  0x1a   :  { %p221_p10 = scmp.ne.s32.totalorder %s40_s25, %s220_s26  ;;  %p226_p12 = scmp.lt.s32.totalorder %s220_s26, %s220_s26 }
  0x1c   :  { %p227_p13 = por %p226_p12, %p225_p11 }
  0x1e   :  { %p228_p0 = pnand %p227_p13, %p221_p10 }
  0x20   :  { %231 = shalt.err (!%p228_p0)
}
  0x21   :  { %42 = dma.hbm_to_vmem [thread:$0]  %s298_s2, 64, %s40_s25, [#allocation6]  }
  0x22   :  { %252 = dma.done.wait [#allocation3], 384  }
  0x23   :  { %253 = vsyncadd [#allocation3], 4294966912 }
  0x24   :  { %254 = dma.done.wait [#allocation6], 128  }
  0x25   :  { %255 = vsyncadd [#allocation6], 4294967168  ;;  %v52_v0 = vld [vmem:[#allocation2] sm:$0xff]  ;;  %v80_v1 = vld [vmem:[#allocation2 + $0x8] sm:$0xff]  ;;  %s263_s0 = smov [#allocation8]  }
  0x26   :  { %53 = vadd.xlane.f32.xlu0 %v52_v0  ;;  %v55_v2 = vmul.f32 %v52_v0, %v52_v0  ;;  %v83_v3 = vmul.f32 %v80_v1, %v80_v1  ;;  %v109_v4 = vld [vmem:[#allocation2 + $0x10] sm:$0xff]  ;;  %v154_v30 = vld [vmem:[#allocation5] ss:$0 sm:$0xff]  ;;  %v156_v33 = vld [vmem:[#allocation5 + $0x1] ss:$0 sm:$0xff]  ;;  %s144_s2 = sshll.u32 %s263_s0, 4  ;;  %s145_s2 = int_to_ptr.vmem [resolvable:$true] %s144_s2 }
  0x27   :  { %v112_v5 = vmul.f32 %v109_v4, %v109_v4  ;;  %v155_v36 = vld [vmem:[#allocation7] ss:$0 sm:$0xff]  ;;  %v157_v37 = vld [vmem:[#allocation7 + $0x1] ss:$0 sm:$0xff]  ;;  %v158_v41 = vld [vmem:[#allocation5 + $0x2] ss:$0 sm:$0xff]  ;;  %p237_p2 = scmp.lt.s32.totalorder %s145_s2, %s145_s2 }
  0x28   :  { %56 = vadd.xlane.f32.xlu1 %v55_v2  ;;  %v159_v45 = vld [vmem:[#allocation7 + $0x2] ss:$0 sm:$0xff]  ;;  %s232_s28 = scalar_lea.vmem %s145_s2, 128 }
  0x29   :  { %p233_p1 = scmp.ne.s32.totalorder %s145_s2, %s232_s28  ;;  %p238_p3 = scmp.lt.s32.totalorder %s232_s28, %s232_s28 }
  0x2a   :  { %81 = vadd.xlane.f32.xlu0 %v80_v1 }
  0x2b   :  { %p239_p4 = por %p238_p3, %p237_p2 }
  0x2c   :  { %84 = vadd.xlane.f32.xlu1 %v83_v3 }
  0x2d   :  { %p240_p5 = pnand %p239_p4, %p233_p1 }
  0x2e   :  { %110 = vadd.xlane.f32.xlu0 %v109_v4 }
  0x30   :  { %113 = vadd.xlane.f32.xlu1 %v112_v5 }
  0xaf   :  { %v54_v6 = vpop.xlane.xlu0 %53 }
  0xb0   :  { %v58_v7 = vmul.f32 0.0078125, %v54_v6 }
  0xb1   :  { %v57_v8 = vpop.xlane.xlu1 %56 }
  0xb2   :  { %v60_v9 = vmul.f32 %v58_v7, %v58_v7  ;;  %v59_v10 = vmul.f32 0.0078125, %v57_v8  ;;  %v66_v27 = vsub.f32 %v52_v0, %v58_v7 }
  0xb3   :  { %v82_v11 = vpop.xlane.xlu0 %81 }
  0xb4   :  { %v61_v12 = vsub.f32 %v59_v10, %v60_v9  ;;  %v86_v13 = vmul.f32 0.0078125, %v82_v11 }
  0xb5   :  { %v85_v14 = vpop.xlane.xlu1 %84 }
  0xb6   :  { %v62_v15 = vadd.f32 1e-05, %v61_v12  ;;  %v88_v16 = vmul.f32 %v86_v13, %v86_v13  ;;  %v87_v17 = vmul.f32 0.0078125, %v85_v14  ;;  %v94_v31 = vsub.f32 %v80_v1, %v86_v13 }
  0xb7   :  { %v111_v18 = vpop.xlane.xlu0 %110 }
  0xb8   :  { %166 = vrsqrt.f32 %v62_v15  ;;  %v89_v19 = vsub.f32 %v87_v17, %v88_v16  ;;  %v115_v20 = vmul.f32 0.0078125, %v111_v18 }
  0xb9   :  { %v114_v21 = vpop.xlane.xlu1 %113 }
  0xba   :  { %v90_v22 = vadd.f32 1e-05, %v89_v19  ;;  %v117_v23 = vmul.f32 %v115_v20, %v115_v20  ;;  %v116_v24 = vmul.f32 0.0078125, %v114_v21  ;;  %v123_v38 = vsub.f32 %v109_v4, %v115_v20 }
  0xbc   :  { %168 = vrsqrt.f32 %v90_v22  ;;  %v118_v25 = vsub.f32 %v116_v24, %v117_v23 }
  0xbe   :  { %v119_v26 = vadd.f32 1e-05, %v118_v25 }
  0xc0   :  { %170 = vrsqrt.f32 %v119_v26 }
  0xc5   :  { %v167_v28 = vpop.eup %166 }
  0xc6   :  { %v67_v29 = vmul.f32 %v167_v28, %v66_v27 }
  0xc8   :  { %v72_v34 = vmul.f32 %v154_v30, %v67_v29 }
  0xc9   :  { %v169_v32 = vpop.eup %168 }
  0xca   :  { %v95_v35 = vmul.f32 %v169_v32, %v94_v31  ;;  %v77_v42 = vadd.f32 %v155_v36, %v72_v34 }
  0xcc   :  { %v100_v39 = vmul.f32 %v156_v33, %v95_v35  ;;  %v78_v48 = vmax.f32 %v77_v42, 0.0 }
  0xcd   :  { %v171_v40 = vpop.eup %170 }
  0xce   :  { %v105_v43 = vadd.f32 %v157_v37, %v100_v39  ;;  %v124_v44 = vmul.f32 %v171_v40, %v123_v38 }
  0xd0   :  { %v106_v46 = vmax.f32 %v105_v43, 0.0  ;;  %v129_v47 = vmul.f32 %v158_v41, %v124_v44 }
  0xd2   :  { %v134_v49 = vadd.f32 %v159_v45, %v129_v47  ;;  %v107_v50 = vadd.f32 %v106_v46, %v78_v48 }
  0xd4   :  { %v135_v51 = vmax.f32 %v134_v49, 0.0 }
  0xd6   :  { %v136_v52 = vadd.f32 %v135_v51, %v107_v50 }
  0xd8   :  { %137 = vst [vmem:[#allocation8] sm:$0xff] %v136_v52 }
  0xd9   :  { %243 = shalt.err (!%p240_p5)
}
  0xda   :  { %147 = dma.vmem_to_hbm [thread:$0]  %s145_s2, 128, %s299_s3, [#allocation4]  }
  0xdb   :  { %256 = dma.done.wait [#allocation4], 128  }
  0xdc   :  { %257 = vsyncadd [#allocation4], 4294967168 }
  0xdd   :  { %151 = vsyncpa [#allocation3], 1 }
  0xde   :  { %152 = vsyncpa [#allocation6], 1 }
  0xdf   :  { %153 = vsyncpa [#allocation4], 1 }

</bundles_post_ra>
